<compile_context>
chip_gen: v7x
topology: tpu7x:2x2x1
jax: 0.10.0
libtpu: 0.0.40
codegen_flags: <defaults>
</compile_context>

<pallas_src>
import functools

import jax
import jax.numpy as jnp
from jax.experimental import pallas as pl
from jax.experimental.pallas import tpu as pltpu


def _grid_select_indices(input_size: int, lstm_num_square: int = 3):
    grid_len = input_size // lstm_num_square
    return list(range(grid_len // 2, input_size, grid_len))


def _round_up(x: int, m: int) -> int:
    return ((x + m - 1) // m) * m


def _select_center_kernel(x_hbm, o_ref, buf, sems, *, idx, block_rows, total, n):
    """One grid step = `block_rows` images.

    x_hbm : (total, H, W) raw HBM ref (memory_space=pl.ANY)
    o_ref : (block_rows, n*n) VMEM output block (auto-pipelined)
    buf   : (2*n, block_rows, W) VMEM scratch — double buffer holding the n
            selected rows of every image in the block
    sems  : (2*n,) DMA completion semaphores
    """
    T = block_rows
    b = pl.program_id(0)
    nblocks = pl.num_programs(0)
    slot = b % 2

    # Clamp so the last (possibly partial) block reads images
    # [total - T, total) instead of running past the end of the input.
    # total >= T always holds; earlier blocks are never clamped.
    def block_start(bb):
        return jnp.minimum(bb * T, total - T)

    def start_fetch(bb, which_slot):
        bs = block_start(bb)
        for i, r in enumerate(idx):
            pltpu.make_async_copy(
                x_hbm.at[pl.ds(bs, T), r, :],          # (T, W) selected row r
                buf.at[which_slot * n + i],
                sems.at[which_slot * n + i],
            ).start()

    def wait_fetch(which_slot):
        for i, r in enumerate(idx):
            pltpu.make_async_copy(
                x_hbm.at[pl.ds(0, T), r, :],           # shape-matched descriptor
                buf.at[which_slot * n + i],
                sems.at[which_slot * n + i],
            ).wait()

    # Prologue: fetch block 0 (grid is sequential, so this runs exactly once).
    @pl.when(b == 0)
    def _():
        start_fetch(0, 0)

    wait_fetch(slot)

    # Prefetch the next block into the other slot so DMAs stream back-to-back.
    @pl.when(b + 1 < nblocks)
    def _():
        start_fetch(b + 1, 1 - slot)

    # Column gather via static Ref slices: non-selected elements are never
    # touched (no 0*Inf / NaN leakage), no mask multiplies, dtype-agnostic.
    for i in range(n):
        row_ref = buf.at[slot * n + i]                 # (T, W) selected row i
        for j, c in enumerate(idx):
            k = i * n + j
            o_ref[:, k:k + 1] = row_ref[:, c:c + 1]


def select_center(x, input_size: int, lstm_num_square: int = 3,
                  *, max_images_per_block: int = 2048):
    """x: (seq_len, batch, input_size, input_size) -> (seq_len, batch, n, n)."""
    S, B, H, W = x.shape
    assert H == input_size and W == input_size
    assert 1 <= lstm_num_square <= input_size

    idx = _grid_select_indices(input_size, lstm_num_square)
    n = len(idx)
    nn = n * n
    total = S * B

    # Free (metadata-only) reshape of a contiguous array; no HBM copy.
    x_flat = x.reshape(total, H, W)

    # --- Block sizing: budget counts *padded* lanes (W -> 128) --------------
    max_t = max(8, _round_up(max_images_per_block, 8))
    if total <= max_t:
        block_rows, nblocks = total, 1                 # single block, no padding
    else:
        block_rows = min(max_t, _round_up(pl.cdiv(total, 2), 8))
        nblocks = pl.cdiv(total, block_rows)
    padded_rows = nblocks * block_rows

    kernel = functools.partial(
        _select_center_kernel,
        idx=idx, block_rows=block_rows, total=total, n=n)

    out_flat = pl.pallas_call(
        kernel,
        out_shape=jax.ShapeDtypeStruct((padded_rows, nn), x.dtype),
        grid_spec=pltpu.PrefetchScalarGridSpec(
            num_scalar_prefetch=0,
            grid=(nblocks,),
            in_specs=[pl.BlockSpec(memory_space=pl.ANY)],   # stay in HBM; manual DMA
            out_specs=pl.BlockSpec((block_rows, nn), lambda b: (b, 0)),
            scratch_shapes=[
                pltpu.VMEM((2 * n, block_rows, W), x.dtype),  # row double-buffer
                pltpu.SemaphoreType.DMA((2 * n,)),
            ]),
        compiler_params=pltpu.CompilerParams(
            # Manual prefetch pipeline keys its prologue on program_id == 0 and
            # the kernel is HBM-bound, so keep the grid sequential.
            dimension_semantics=("arbitrary",),
            vmem_limit_bytes=32 * 1024 * 1024,
        ),
    )(x_flat)

    if padded_rows != total:
        # The clamped last block wrote images [total - T, total) into output
        # rows [cut, cut + T); drop the duplicated prefix rows.
        cut = (nblocks - 1) * block_rows
        shift = padded_rows - total
        out_flat = jnp.concatenate([out_flat[:cut], out_flat[cut + shift:]],
                                   axis=0)

    # TODO(synk): if profiling ever shows the (T, 9) masked-store / writeback
    # path, pack several images per output row to make stores lane-dense.
    return out_flat.reshape(S, B, n, n)


def _reference(x, input_size, lstm_num_square=3):
    idx = jnp.array(_grid_select_indices(input_size, lstm_num_square))
    return jnp.take(jnp.take(x, idx, axis=-1), idx, axis=-2)


if __name__ == "__main__":
    key = jax.random.PRNGKey(0)
    k0, k1 = jax.random.split(key)

    # Main case: shapes implied by the module.
    seq_len, batch, input_size, lstm_num_square = 8, 2, 16, 3
    x = jax.random.normal(k0, (seq_len, batch, input_size, input_size),
                          dtype=jnp.float32)
    out = jax.block_until_ready(select_center(x, input_size, lstm_num_square))
    ref = _reference(x, input_size, lstm_num_square)
    assert out.shape == (seq_len, batch, 3, 3), out.shape
    assert out.dtype == x.dtype
    assert bool(jnp.array_equal(out, ref)), "mismatch vs reference gather"

    # Multi-block path with a non-dividing block size: exercises the manual
    # double-buffered prefetch, the clamped last block and the output
    # un-shuffle (total = 21 images, 8 images per block -> 3 blocks).
    x2 = jax.random.normal(k1, (7, 3, input_size, input_size),
                           dtype=jnp.float32)
    out2 = jax.block_until_ready(
        select_center(x2, input_size, lstm_num_square, max_images_per_block=8))
    ref2 = _reference(x2, input_size, lstm_num_square)
    assert bool(jnp.array_equal(out2, ref2)), "mismatch in multi-block path"

    print("KERNEL_OK")
</pallas_src>

<mosaic_0001>
module attributes {stable_mosaic.version = 11 : i64} {
  func.func @_select_center_kernel(%arg0: i32, %arg1: memref<16x16x16xf32, #tpu.memory_space<any>>, %arg2: memref<16x9xf32, #tpu.memory_space<vmem>>, %arg3: memref<6x16x16xf32, #tpu.memory_space<vmem>>, %arg4: memref<6x!tpu.dma_semaphore, #tpu.memory_space<semaphore_mem>>) attributes {dimension_semantics = [#tpu.dimension_semantics<arbitrary>], iteration_bounds = array<i64: 1>, scalar_prefetch = 0 : i64, scratch_operands = 2 : i64, tpu.core_type = #tpu.core_type<tc>, window_params = [{}, {transform_indices = @transform_1, window_bounds = array<i64: 16, 9>}]} {
    %c2_i32 = arith.constant 2 : i32
    %c0_i32 = arith.constant 0 : i32
    %0 = arith.cmpi eq, %c2_i32, %c0_i32 : i32
    %c1_i32 = arith.constant 1 : i32
    %1 = arith.select %0, %c1_i32, %c2_i32 : i32
    %2 = arith.remsi %arg0, %1 : i32
    %c0_i32_0 = arith.constant 0 : i32
    %3 = arith.cmpi ne, %2, %c0_i32_0 : i32
    %c0_i32_1 = arith.constant 0 : i32
    %4 = arith.cmpi slt, %2, %c0_i32_1 : i32
    %c0_i32_2 = arith.constant 0 : i32
    %5 = arith.cmpi slt, %1, %c0_i32_2 : i32
    %6 = arith.xori %4, %5 : i1
    %7 = arith.andi %6, %3 : i1
    %8 = arith.addi %2, %1 : i32
    %9 = arith.select %7, %8, %2 : i32
    %c0_i32_3 = arith.constant 0 : i32
    %10 = arith.cmpi eq, %arg0, %c0_i32_3 : i32
    %11 = arith.extui %10 : i1 to i32
    %c0_i32_4 = arith.constant 0 : i32
    %12 = arith.cmpi ne, %11, %c0_i32_4 : i32
    scf.if %12 {
      %c0_i32_82 = arith.constant 0 : i32
      %c0_i32_83 = arith.constant 0 : i32
      %89 = arith.minsi %c0_i32_82, %c0_i32_83 : i32
      %c2_i32_84 = arith.constant 2 : i32
      %c0_i32_85 = arith.constant 0 : i32
      %c0_i32_86 = arith.constant 0 : i32
      %c0_i32_87 = arith.constant 0 : i32
      %90 = tpu.memref_slice %arg1[%89, %c2_i32_84, %c0_i32_87] : memref<16x16x16xf32, #tpu.memory_space<any>> -> memref<16x1x16xf32, #tpu.memory_space<any>>
      %91 = tpu.memref_squeeze %90 : memref<16x1x16xf32, #tpu.memory_space<any>> -> memref<16x16xf32, #tpu.memory_space<any>>
      %c0_i32_88 = arith.constant 0 : i32
      %c0_i32_89 = arith.constant 0 : i32
      %92 = tpu.memref_slice %arg3[%c0_i32_85, %c0_i32_88, %c0_i32_89] : memref<6x16x16xf32, #tpu.memory_space<vmem>> -> memref<1x16x16xf32, #tpu.memory_space<vmem>>
      %93 = tpu.memref_squeeze %92 : memref<1x16x16xf32, #tpu.memory_space<vmem>> -> memref<16x16xf32, #tpu.memory_space<vmem>>
      %94 = tpu.memref_slice %arg4[%c0_i32_86] : memref<6x!tpu.dma_semaphore, #tpu.memory_space<semaphore_mem>> -> memref<1x!tpu.dma_semaphore, #tpu.memory_space<semaphore_mem>>
      %95 = tpu.memref_squeeze %94 : memref<1x!tpu.dma_semaphore, #tpu.memory_space<semaphore_mem>> -> memref<!tpu.dma_semaphore, #tpu.memory_space<semaphore_mem>>
      tpu.enqueue_dma source(%91 : memref<16x16xf32, #tpu.memory_space<any>>) target(%93 : memref<16x16xf32, #tpu.memory_space<vmem>>) target_semaphore(%95 : memref<!tpu.dma_semaphore, #tpu.memory_space<semaphore_mem>>)
      %c7_i32_90 = arith.constant 7 : i32
      %c1_i32_91 = arith.constant 1 : i32
      %c1_i32_92 = arith.constant 1 : i32
      %c0_i32_93 = arith.constant 0 : i32
      %96 = tpu.memref_slice %arg1[%89, %c7_i32_90, %c0_i32_93] : memref<16x16x16xf32, #tpu.memory_space<any>> -> memref<16x1x16xf32, #tpu.memory_space<any>>
      %97 = tpu.memref_squeeze %96 : memref<16x1x16xf32, #tpu.memory_space<any>> -> memref<16x16xf32, #tpu.memory_space<any>>
      %c0_i32_94 = arith.constant 0 : i32
      %c0_i32_95 = arith.constant 0 : i32
      %98 = tpu.memref_slice %arg3[%c1_i32_91, %c0_i32_94, %c0_i32_95] : memref<6x16x16xf32, #tpu.memory_space<vmem>> -> memref<1x16x16xf32, #tpu.memory_space<vmem>>
      %99 = tpu.memref_squeeze %98 : memref<1x16x16xf32, #tpu.memory_space<vmem>> -> memref<16x16xf32, #tpu.memory_space<vmem>>
      %100 = tpu.memref_slice %arg4[%c1_i32_92] : memref<6x!tpu.dma_semaphore, #tpu.memory_space<semaphore_mem>> -> memref<1x!tpu.dma_semaphore, #tpu.memory_space<semaphore_mem>>
      %101 = tpu.memref_squeeze %100 : memref<1x!tpu.dma_semaphore, #tpu.memory_space<semaphore_mem>> -> memref<!tpu.dma_semaphore, #tpu.memory_space<semaphore_mem>>
      tpu.enqueue_dma source(%97 : memref<16x16xf32, #tpu.memory_space<any>>) target(%99 : memref<16x16xf32, #tpu.memory_space<vmem>>) target_semaphore(%101 : memref<!tpu.dma_semaphore, #tpu.memory_space<semaphore_mem>>)
      %c12_i32_96 = arith.constant 12 : i32
      %c2_i32_97 = arith.constant 2 : i32
      %c2_i32_98 = arith.constant 2 : i32
      %c0_i32_99 = arith.constant 0 : i32
      %102 = tpu.memref_slice %arg1[%89, %c12_i32_96, %c0_i32_99] : memref<16x16x16xf32, #tpu.memory_space<any>> -> memref<16x1x16xf32, #tpu.memory_space<any>>
      %103 = tpu.memref_squeeze %102 : memref<16x1x16xf32, #tpu.memory_space<any>> -> memref<16x16xf32, #tpu.memory_space<any>>
      %c0_i32_100 = arith.constant 0 : i32
      %c0_i32_101 = arith.constant 0 : i32
      %104 = tpu.memref_slice %arg3[%c2_i32_97, %c0_i32_100, %c0_i32_101] : memref<6x16x16xf32, #tpu.memory_space<vmem>> -> memref<1x16x16xf32, #tpu.memory_space<vmem>>
      %105 = tpu.memref_squeeze %104 : memref<1x16x16xf32, #tpu.memory_space<vmem>> -> memref<16x16xf32, #tpu.memory_space<vmem>>
      %106 = tpu.memref_slice %arg4[%c2_i32_98] : memref<6x!tpu.dma_semaphore, #tpu.memory_space<semaphore_mem>> -> memref<1x!tpu.dma_semaphore, #tpu.memory_space<semaphore_mem>>
      %107 = tpu.memref_squeeze %106 : memref<1x!tpu.dma_semaphore, #tpu.memory_space<semaphore_mem>> -> memref<!tpu.dma_semaphore, #tpu.memory_space<semaphore_mem>>
      tpu.enqueue_dma source(%103 : memref<16x16xf32, #tpu.memory_space<any>>) target(%105 : memref<16x16xf32, #tpu.memory_space<vmem>>) target_semaphore(%107 : memref<!tpu.dma_semaphore, #tpu.memory_space<semaphore_mem>>)
    } else {
    }
    %c3_i32 = arith.constant 3 : i32
    %13 = arith.muli %9, %c3_i32 : i32
    %c0_i32_5 = arith.constant 0 : i32
    %14 = arith.addi %13, %c0_i32_5 : i32
    %c3_i32_6 = arith.constant 3 : i32
    %15 = arith.muli %9, %c3_i32_6 : i32
    %c0_i32_7 = arith.constant 0 : i32
    %16 = arith.addi %15, %c0_i32_7 : i32
    %c2_i32_8 = arith.constant 2 : i32
    %c0_i32_9 = arith.constant 0 : i32
    %c0_i32_10 = arith.constant 0 : i32
    %17 = tpu.memref_slice %arg1[%c0_i32_9, %c2_i32_8, %c0_i32_10] : memref<16x16x16xf32, #tpu.memory_space<any>> -> memref<16x1x16xf32, #tpu.memory_space<any>>
    %18 = tpu.memref_squeeze %17 : memref<16x1x16xf32, #tpu.memory_space<any>> -> memref<16x16xf32, #tpu.memory_space<any>>
    %c0_i32_11 = arith.constant 0 : i32
    %c0_i32_12 = arith.constant 0 : i32
    %19 = tpu.memref_slice %arg3[%14, %c0_i32_11, %c0_i32_12] : memref<6x16x16xf32, #tpu.memory_space<vmem>> -> memref<1x16x16xf32, #tpu.memory_space<vmem>>
    %20 = tpu.memref_squeeze %19 : memref<1x16x16xf32, #tpu.memory_space<vmem>> -> memref<16x16xf32, #tpu.memory_space<vmem>>
    %21 = tpu.memref_slice %arg4[%16] : memref<6x!tpu.dma_semaphore, #tpu.memory_space<semaphore_mem>> -> memref<1x!tpu.dma_semaphore, #tpu.memory_space<semaphore_mem>>
    %22 = tpu.memref_squeeze %21 : memref<1x!tpu.dma_semaphore, #tpu.memory_space<semaphore_mem>> -> memref<!tpu.dma_semaphore, #tpu.memory_space<semaphore_mem>>
    tpu.wait_dma2 semaphore(%22 : memref<!tpu.dma_semaphore, #tpu.memory_space<semaphore_mem>>) src(%18 : memref<16x16xf32, #tpu.memory_space<any>>) dst(%20 : memref<16x16xf32, #tpu.memory_space<vmem>>)
    %c3_i32_13 = arith.constant 3 : i32
    %23 = arith.muli %9, %c3_i32_13 : i32
    %c1_i32_14 = arith.constant 1 : i32
    %24 = arith.addi %23, %c1_i32_14 : i32
    %c3_i32_15 = arith.constant 3 : i32
    %25 = arith.muli %9, %c3_i32_15 : i32
    %c1_i32_16 = arith.constant 1 : i32
    %26 = arith.addi %25, %c1_i32_16 : i32
    %c7_i32 = arith.constant 7 : i32
    %c0_i32_17 = arith.constant 0 : i32
    %c0_i32_18 = arith.constant 0 : i32
    %27 = tpu.memref_slice %arg1[%c0_i32_17, %c7_i32, %c0_i32_18] : memref<16x16x16xf32, #tpu.memory_space<any>> -> memref<16x1x16xf32, #tpu.memory_space<any>>
    %28 = tpu.memref_squeeze %27 : memref<16x1x16xf32, #tpu.memory_space<any>> -> memref<16x16xf32, #tpu.memory_space<any>>
    %c0_i32_19 = arith.constant 0 : i32
    %c0_i32_20 = arith.constant 0 : i32
    %29 = tpu.memref_slice %arg3[%24, %c0_i32_19, %c0_i32_20] : memref<6x16x16xf32, #tpu.memory_space<vmem>> -> memref<1x16x16xf32, #tpu.memory_space<vmem>>
    %30 = tpu.memref_squeeze %29 : memref<1x16x16xf32, #tpu.memory_space<vmem>> -> memref<16x16xf32, #tpu.memory_space<vmem>>
    %31 = tpu.memref_slice %arg4[%26] : memref<6x!tpu.dma_semaphore, #tpu.memory_space<semaphore_mem>> -> memref<1x!tpu.dma_semaphore, #tpu.memory_space<semaphore_mem>>
    %32 = tpu.memref_squeeze %31 : memref<1x!tpu.dma_semaphore, #tpu.memory_space<semaphore_mem>> -> memref<!tpu.dma_semaphore, #tpu.memory_space<semaphore_mem>>
    tpu.wait_dma2 semaphore(%32 : memref<!tpu.dma_semaphore, #tpu.memory_space<semaphore_mem>>) src(%28 : memref<16x16xf32, #tpu.memory_space<any>>) dst(%30 : memref<16x16xf32, #tpu.memory_space<vmem>>)
    %c3_i32_21 = arith.constant 3 : i32
    %33 = arith.muli %9, %c3_i32_21 : i32
    %c2_i32_22 = arith.constant 2 : i32
    %34 = arith.addi %33, %c2_i32_22 : i32
    %c3_i32_23 = arith.constant 3 : i32
    %35 = arith.muli %9, %c3_i32_23 : i32
    %c2_i32_24 = arith.constant 2 : i32
    %36 = arith.addi %35, %c2_i32_24 : i32
    %c12_i32 = arith.constant 12 : i32
    %c0_i32_25 = arith.constant 0 : i32
    %c0_i32_26 = arith.constant 0 : i32
    %37 = tpu.memref_slice %arg1[%c0_i32_25, %c12_i32, %c0_i32_26] : memref<16x16x16xf32, #tpu.memory_space<any>> -> memref<16x1x16xf32, #tpu.memory_space<any>>
    %38 = tpu.memref_squeeze %37 : memref<16x1x16xf32, #tpu.memory_space<any>> -> memref<16x16xf32, #tpu.memory_space<any>>
    %c0_i32_27 = arith.constant 0 : i32
    %c0_i32_28 = arith.constant 0 : i32
    %39 = tpu.memref_slice %arg3[%34, %c0_i32_27, %c0_i32_28] : memref<6x16x16xf32, #tpu.memory_space<vmem>> -> memref<1x16x16xf32, #tpu.memory_space<vmem>>
    %40 = tpu.memref_squeeze %39 : memref<1x16x16xf32, #tpu.memory_space<vmem>> -> memref<16x16xf32, #tpu.memory_space<vmem>>
    %41 = tpu.memref_slice %arg4[%36] : memref<6x!tpu.dma_semaphore, #tpu.memory_space<semaphore_mem>> -> memref<1x!tpu.dma_semaphore, #tpu.memory_space<semaphore_mem>>
    %42 = tpu.memref_squeeze %41 : memref<1x!tpu.dma_semaphore, #tpu.memory_space<semaphore_mem>> -> memref<!tpu.dma_semaphore, #tpu.memory_space<semaphore_mem>>
    tpu.wait_dma2 semaphore(%42 : memref<!tpu.dma_semaphore, #tpu.memory_space<semaphore_mem>>) src(%38 : memref<16x16xf32, #tpu.memory_space<any>>) dst(%40 : memref<16x16xf32, #tpu.memory_space<vmem>>)
    %c1_i32_29 = arith.constant 1 : i32
    %43 = arith.addi %arg0, %c1_i32_29 : i32
    %c1_i32_30 = arith.constant 1 : i32
    %44 = arith.cmpi slt, %43, %c1_i32_30 : i32
    %45 = arith.extui %44 : i1 to i32
    %c0_i32_31 = arith.constant 0 : i32
    %46 = arith.cmpi ne, %45, %c0_i32_31 : i32
    scf.if %46 {
      %c1_i32_82 = arith.constant 1 : i32
      %89 = arith.addi %arg0, %c1_i32_82 : i32
      %c1_i32_83 = arith.constant 1 : i32
      %90 = arith.subi %c1_i32_83, %9 : i32
      %c16_i32 = arith.constant 16 : i32
      %91 = arith.muli %89, %c16_i32 : i32
      %c0_i32_84 = arith.constant 0 : i32
      %92 = arith.minsi %91, %c0_i32_84 : i32
      %c3_i32_85 = arith.constant 3 : i32
      %93 = arith.muli %90, %c3_i32_85 : i32
      %c0_i32_86 = arith.constant 0 : i32
      %94 = arith.addi %93, %c0_i32_86 : i32
      %c3_i32_87 = arith.constant 3 : i32
      %95 = arith.muli %90, %c3_i32_87 : i32
      %c0_i32_88 = arith.constant 0 : i32
      %96 = arith.addi %95, %c0_i32_88 : i32
      %c2_i32_89 = arith.constant 2 : i32
      %c0_i32_90 = arith.constant 0 : i32
      %97 = tpu.memref_slice %arg1[%92, %c2_i32_89, %c0_i32_90] : memref<16x16x16xf32, #tpu.memory_space<any>> -> memref<16x1x16xf32, #tpu.memory_space<any>>
      %98 = tpu.memref_squeeze %97 : memref<16x1x16xf32, #tpu.memory_space<any>> -> memref<16x16xf32, #tpu.memory_space<any>>
      %c0_i32_91 = arith.constant 0 : i32
      %c0_i32_92 = arith.constant 0 : i32
      %99 = tpu.memref_slice %arg3[%94, %c0_i32_91, %c0_i32_92] : memref<6x16x16xf32, #tpu.memory_space<vmem>> -> memref<1x16x16xf32, #tpu.memory_space<vmem>>
      %100 = tpu.memref_squeeze %99 : memref<1x16x16xf32, #tpu.memory_space<vmem>> -> memref<16x16xf32, #tpu.memory_space<vmem>>
      %101 = tpu.memref_slice %arg4[%96] : memref<6x!tpu.dma_semaphore, #tpu.memory_space<semaphore_mem>> -> memref<1x!tpu.dma_semaphore, #tpu.memory_space<semaphore_mem>>
      %102 = tpu.memref_squeeze %101 : memref<1x!tpu.dma_semaphore, #tpu.memory_space<semaphore_mem>> -> memref<!tpu.dma_semaphore, #tpu.memory_space<semaphore_mem>>
      tpu.enqueue_dma source(%98 : memref<16x16xf32, #tpu.memory_space<any>>) target(%100 : memref<16x16xf32, #tpu.memory_space<vmem>>) target_semaphore(%102 : memref<!tpu.dma_semaphore, #tpu.memory_space<semaphore_mem>>)
      %c3_i32_93 = arith.constant 3 : i32
      %103 = arith.muli %90, %c3_i32_93 : i32
      %c1_i32_94 = arith.constant 1 : i32
      %104 = arith.addi %103, %c1_i32_94 : i32
      %c3_i32_95 = arith.constant 3 : i32
      %105 = arith.muli %90, %c3_i32_95 : i32
      %c1_i32_96 = arith.constant 1 : i32
      %106 = arith.addi %105, %c1_i32_96 : i32
      %c7_i32_97 = arith.constant 7 : i32
      %c0_i32_98 = arith.constant 0 : i32
      %107 = tpu.memref_slice %arg1[%92, %c7_i32_97, %c0_i32_98] : memref<16x16x16xf32, #tpu.memory_space<any>> -> memref<16x1x16xf32, #tpu.memory_space<any>>
      %108 = tpu.memref_squeeze %107 : memref<16x1x16xf32, #tpu.memory_space<any>> -> memref<16x16xf32, #tpu.memory_space<any>>
      %c0_i32_99 = arith.constant 0 : i32
      %c0_i32_100 = arith.constant 0 : i32
      %109 = tpu.memref_slice %arg3[%104, %c0_i32_99, %c0_i32_100] : memref<6x16x16xf32, #tpu.memory_space<vmem>> -> memref<1x16x16xf32, #tpu.memory_space<vmem>>
      %110 = tpu.memref_squeeze %109 : memref<1x16x16xf32, #tpu.memory_space<vmem>> -> memref<16x16xf32, #tpu.memory_space<vmem>>
      %111 = tpu.memref_slice %arg4[%106] : memref<6x!tpu.dma_semaphore, #tpu.memory_space<semaphore_mem>> -> memref<1x!tpu.dma_semaphore, #tpu.memory_space<semaphore_mem>>
      %112 = tpu.memref_squeeze %111 : memref<1x!tpu.dma_semaphore, #tpu.memory_space<semaphore_mem>> -> memref<!tpu.dma_semaphore, #tpu.memory_space<semaphore_mem>>
      tpu.enqueue_dma source(%108 : memref<16x16xf32, #tpu.memory_space<any>>) target(%110 : memref<16x16xf32, #tpu.memory_space<vmem>>) target_semaphore(%112 : memref<!tpu.dma_semaphore, #tpu.memory_space<semaphore_mem>>)
      %c3_i32_101 = arith.constant 3 : i32
      %113 = arith.muli %90, %c3_i32_101 : i32
      %c2_i32_102 = arith.constant 2 : i32
      %114 = arith.addi %113, %c2_i32_102 : i32
      %c3_i32_103 = arith.constant 3 : i32
      %115 = arith.muli %90, %c3_i32_103 : i32
      %c2_i32_104 = arith.constant 2 : i32
      %116 = arith.addi %115, %c2_i32_104 : i32
      %c12_i32_105 = arith.constant 12 : i32
      %c0_i32_106 = arith.constant 0 : i32
      %117 = tpu.memref_slice %arg1[%92, %c12_i32_105, %c0_i32_106] : memref<16x16x16xf32, #tpu.memory_space<any>> -> memref<16x1x16xf32, #tpu.memory_space<any>>
      %118 = tpu.memref_squeeze %117 : memref<16x1x16xf32, #tpu.memory_space<any>> -> memref<16x16xf32, #tpu.memory_space<any>>
      %c0_i32_107 = arith.constant 0 : i32
      %c0_i32_108 = arith.constant 0 : i32
      %119 = tpu.memref_slice %arg3[%114, %c0_i32_107, %c0_i32_108] : memref<6x16x16xf32, #tpu.memory_space<vmem>> -> memref<1x16x16xf32, #tpu.memory_space<vmem>>
      %120 = tpu.memref_squeeze %119 : memref<1x16x16xf32, #tpu.memory_space<vmem>> -> memref<16x16xf32, #tpu.memory_space<vmem>>
      %121 = tpu.memref_slice %arg4[%116] : memref<6x!tpu.dma_semaphore, #tpu.memory_space<semaphore_mem>> -> memref<1x!tpu.dma_semaphore, #tpu.memory_space<semaphore_mem>>
      %122 = tpu.memref_squeeze %121 : memref<1x!tpu.dma_semaphore, #tpu.memory_space<semaphore_mem>> -> memref<!tpu.dma_semaphore, #tpu.memory_space<semaphore_mem>>
      tpu.enqueue_dma source(%118 : memref<16x16xf32, #tpu.memory_space<any>>) target(%120 : memref<16x16xf32, #tpu.memory_space<vmem>>) target_semaphore(%122 : memref<!tpu.dma_semaphore, #tpu.memory_space<semaphore_mem>>)
    } else {
    }
    %c3_i32_32 = arith.constant 3 : i32
    %47 = arith.muli %9, %c3_i32_32 : i32
    %c0_i32_33 = arith.constant 0 : i32
    %48 = arith.addi %47, %c0_i32_33 : i32
    %c0_i32_34 = arith.constant 0 : i32
    %c0_i32_35 = arith.constant 0 : i32
    %49 = tpu.memref_slice %arg3[%48, %c0_i32_34, %c0_i32_35] : memref<6x16x16xf32, #tpu.memory_space<vmem>> -> memref<1x16x16xf32, #tpu.memory_space<vmem>>
    %50 = tpu.memref_squeeze %49 : memref<1x16x16xf32, #tpu.memory_space<vmem>> -> memref<16x16xf32, #tpu.memory_space<vmem>>
    %c0 = arith.constant 0 : index
    %c2 = arith.constant 2 : index
    %51 = vector.load %50[%c0, %c2] : memref<16x16xf32, #tpu.memory_space<vmem>>, vector<16x1xf32>
    %c0_36 = arith.constant 0 : index
    %c0_37 = arith.constant 0 : index
    %52 = vector.load %arg2[%c0_36, %c0_37] : memref<16x9xf32, #tpu.memory_space<vmem>>, vector<16x1xf32>
    tpu.vector_store %arg2[%c0_36, %c0_37], %51 {strides = array<i32>} : memref<16x9xf32, #tpu.memory_space<vmem>>, vector<16x1xf32>,
    %c0_i32_38 = arith.constant 0 : i32
    %c0_i32_39 = arith.constant 0 : i32
    %53 = tpu.memref_slice %arg3[%48, %c0_i32_38, %c0_i32_39] : memref<6x16x16xf32, #tpu.memory_space<vmem>> -> memref<1x16x16xf32, #tpu.memory_space<vmem>>
    %54 = tpu.memref_squeeze %53 : memref<1x16x16xf32, #tpu.memory_space<vmem>> -> memref<16x16xf32, #tpu.memory_space<vmem>>
    %c0_40 = arith.constant 0 : index
    %c7 = arith.constant 7 : index
    %55 = vector.load %54[%c0_40, %c7] : memref<16x16xf32, #tpu.memory_space<vmem>>, vector<16x1xf32>
    %c0_41 = arith.constant 0 : index
    %c1 = arith.constant 1 : index
    %56 = vector.load %arg2[%c0_41, %c1] : memref<16x9xf32, #tpu.memory_space<vmem>>, vector<16x1xf32>
    tpu.vector_store %arg2[%c0_41, %c1], %55 {strides = array<i32>} : memref<16x9xf32, #tpu.memory_space<vmem>>, vector<16x1xf32>,
    %c0_i32_42 = arith.constant 0 : i32
    %c0_i32_43 = arith.constant 0 : i32
    %57 = tpu.memref_slice %arg3[%48, %c0_i32_42, %c0_i32_43] : memref<6x16x16xf32, #tpu.memory_space<vmem>> -> memref<1x16x16xf32, #tpu.memory_space<vmem>>
    %58 = tpu.memref_squeeze %57 : memref<1x16x16xf32, #tpu.memory_space<vmem>> -> memref<16x16xf32, #tpu.memory_space<vmem>>
    %c0_44 = arith.constant 0 : index
    %c12 = arith.constant 12 : index
    %59 = vector.load %58[%c0_44, %c12] : memref<16x16xf32, #tpu.memory_space<vmem>>, vector<16x1xf32>
    %c0_45 = arith.constant 0 : index
    %c2_46 = arith.constant 2 : index
    %60 = vector.load %arg2[%c0_45, %c2_46] : memref<16x9xf32, #tpu.memory_space<vmem>>, vector<16x1xf32>
    tpu.vector_store %arg2[%c0_45, %c2_46], %59 {strides = array<i32>} : memref<16x9xf32, #tpu.memory_space<vmem>>, vector<16x1xf32>,
    %c3_i32_47 = arith.constant 3 : i32
    %61 = arith.muli %9, %c3_i32_47 : i32
    %c1_i32_48 = arith.constant 1 : i32
    %62 = arith.addi %61, %c1_i32_48 : i32
    %c0_i32_49 = arith.constant 0 : i32
    %c0_i32_50 = arith.constant 0 : i32
    %63 = tpu.memref_slice %arg3[%62, %c0_i32_49, %c0_i32_50] : memref<6x16x16xf32, #tpu.memory_space<vmem>> -> memref<1x16x16xf32, #tpu.memory_space<vmem>>
    %64 = tpu.memref_squeeze %63 : memref<1x16x16xf32, #tpu.memory_space<vmem>> -> memref<16x16xf32, #tpu.memory_space<vmem>>
    %c0_51 = arith.constant 0 : index
    %c2_52 = arith.constant 2 : index
    %65 = vector.load %64[%c0_51, %c2_52] : memref<16x16xf32, #tpu.memory_space<vmem>>, vector<16x1xf32>
    %c0_53 = arith.constant 0 : index
    %c3 = arith.constant 3 : index
    %66 = vector.load %arg2[%c0_53, %c3] : memref<16x9xf32, #tpu.memory_space<vmem>>, vector<16x1xf32>
    tpu.vector_store %arg2[%c0_53, %c3], %65 {strides = array<i32>} : memref<16x9xf32, #tpu.memory_space<vmem>>, vector<16x1xf32>,
    %c0_i32_54 = arith.constant 0 : i32
    %c0_i32_55 = arith.constant 0 : i32
    %67 = tpu.memref_slice %arg3[%62, %c0_i32_54, %c0_i32_55] : memref<6x16x16xf32, #tpu.memory_space<vmem>> -> memref<1x16x16xf32, #tpu.memory_space<vmem>>
    %68 = tpu.memref_squeeze %67 : memref<1x16x16xf32, #tpu.memory_space<vmem>> -> memref<16x16xf32, #tpu.memory_space<vmem>>
    %c0_56 = arith.constant 0 : index
    %c7_57 = arith.constant 7 : index
    %69 = vector.load %68[%c0_56, %c7_57] : memref<16x16xf32, #tpu.memory_space<vmem>>, vector<16x1xf32>
    %c0_58 = arith.constant 0 : index
    %c4 = arith.constant 4 : index
    %70 = vector.load %arg2[%c0_58, %c4] : memref<16x9xf32, #tpu.memory_space<vmem>>, vector<16x1xf32>
    tpu.vector_store %arg2[%c0_58, %c4], %69 {strides = array<i32>} : memref<16x9xf32, #tpu.memory_space<vmem>>, vector<16x1xf32>,
    %c0_i32_59 = arith.constant 0 : i32
    %c0_i32_60 = arith.constant 0 : i32
    %71 = tpu.memref_slice %arg3[%62, %c0_i32_59, %c0_i32_60] : memref<6x16x16xf32, #tpu.memory_space<vmem>> -> memref<1x16x16xf32, #tpu.memory_space<vmem>>
    %72 = tpu.memref_squeeze %71 : memref<1x16x16xf32, #tpu.memory_space<vmem>> -> memref<16x16xf32, #tpu.memory_space<vmem>>
    %c0_61 = arith.constant 0 : index
    %c12_62 = arith.constant 12 : index
    %73 = vector.load %72[%c0_61, %c12_62] : memref<16x16xf32, #tpu.memory_space<vmem>>, vector<16x1xf32>
    %c0_63 = arith.constant 0 : index
    %c5 = arith.constant 5 : index
    %74 = vector.load %arg2[%c0_63, %c5] : memref<16x9xf32, #tpu.memory_space<vmem>>, vector<16x1xf32>
    tpu.vector_store %arg2[%c0_63, %c5], %73 {strides = array<i32>} : memref<16x9xf32, #tpu.memory_space<vmem>>, vector<16x1xf32>,
    %c3_i32_64 = arith.constant 3 : i32
    %75 = arith.muli %9, %c3_i32_64 : i32
    %c2_i32_65 = arith.constant 2 : i32
    %76 = arith.addi %75, %c2_i32_65 : i32
    %c0_i32_66 = arith.constant 0 : i32
    %c0_i32_67 = arith.constant 0 : i32
    %77 = tpu.memref_slice %arg3[%76, %c0_i32_66, %c0_i32_67] : memref<6x16x16xf32, #tpu.memory_space<vmem>> -> memref<1x16x16xf32, #tpu.memory_space<vmem>>
    %78 = tpu.memref_squeeze %77 : memref<1x16x16xf32, #tpu.memory_space<vmem>> -> memref<16x16xf32, #tpu.memory_space<vmem>>
    %c0_68 = arith.constant 0 : index
    %c2_69 = arith.constant 2 : index
    %79 = vector.load %78[%c0_68, %c2_69] : memref<16x16xf32, #tpu.memory_space<vmem>>, vector<16x1xf32>
    %c0_70 = arith.constant 0 : index
    %c6 = arith.constant 6 : index
    %80 = vector.load %arg2[%c0_70, %c6] : memref<16x9xf32, #tpu.memory_space<vmem>>, vector<16x1xf32>
    tpu.vector_store %arg2[%c0_70, %c6], %79 {strides = array<i32>} : memref<16x9xf32, #tpu.memory_space<vmem>>, vector<16x1xf32>,
    %c0_i32_71 = arith.constant 0 : i32
    %c0_i32_72 = arith.constant 0 : i32
    %81 = tpu.memref_slice %arg3[%76, %c0_i32_71, %c0_i32_72] : memref<6x16x16xf32, #tpu.memory_space<vmem>> -> memref<1x16x16xf32, #tpu.memory_space<vmem>>
    %82 = tpu.memref_squeeze %81 : memref<1x16x16xf32, #tpu.memory_space<vmem>> -> memref<16x16xf32, #tpu.memory_space<vmem>>
    %c0_73 = arith.constant 0 : index
    %c7_74 = arith.constant 7 : index
    %83 = vector.load %82[%c0_73, %c7_74] : memref<16x16xf32, #tpu.memory_space<vmem>>, vector<16x1xf32>
    %c0_75 = arith.constant 0 : index
    %c7_76 = arith.constant 7 : index
    %84 = vector.load %arg2[%c0_75, %c7_76] : memref<16x9xf32, #tpu.memory_space<vmem>>, vector<16x1xf32>
    tpu.vector_store %arg2[%c0_75, %c7_76], %83 {strides = array<i32>} : memref<16x9xf32, #tpu.memory_space<vmem>>, vector<16x1xf32>,
    %c0_i32_77 = arith.constant 0 : i32
    %c0_i32_78 = arith.constant 0 : i32
    %85 = tpu.memref_slice %arg3[%76, %c0_i32_77, %c0_i32_78] : memref<6x16x16xf32, #tpu.memory_space<vmem>> -> memref<1x16x16xf32, #tpu.memory_space<vmem>>
    %86 = tpu.memref_squeeze %85 : memref<1x16x16xf32, #tpu.memory_space<vmem>> -> memref<16x16xf32, #tpu.memory_space<vmem>>
    %c0_79 = arith.constant 0 : index
    %c12_80 = arith.constant 12 : index
    %87 = vector.load %86[%c0_79, %c12_80] : memref<16x16xf32, #tpu.memory_space<vmem>>, vector<16x1xf32>
    %c0_81 = arith.constant 0 : index
    %c8 = arith.constant 8 : index
    %88 = vector.load %arg2[%c0_81, %c8] : memref<16x9xf32, #tpu.memory_space<vmem>>, vector<16x1xf32>
    tpu.vector_store %arg2[%c0_81, %c8], %87 {strides = array<i32>} : memref<16x9xf32, #tpu.memory_space<vmem>>, vector<16x1xf32>,
    return
  }
  func.func @transform_1(%arg0: i32) -> (i32, i32) {
    %c0_i32 = arith.constant 0 : i32
    %c0_i32_0 = arith.constant 0 : i32
    return %arg0, %c0_i32 : i32, i32
  }
}

</mosaic_0001>

<bundles_post_ra>
// kernel: tpu_custom_call.1
= control target key start
LH: loop header
LB: loop body
LE: loop exit
PB: predicated region body
PF: predicated region fallthrough
CT: control target
= control target key end

     0   :  { %6 = vsyncpa [#allocation5], 0  ;;  %s447_s9 = smov [#allocation2]   ;;  %s564_s0 = inlined_call_operand.hbm [shape: f32[16,16,16], index: 0, kind: input, shape index: {}]   ;;  %s565_s1 = inlined_call_operand.hbm [shape: f32[16,9], index: 1, kind: output, shape index: {}]  }
   0x1   :  { %s476_s8 = scalar_lea.hbm %s564_s0, 32  ;;  %s21_s10 = sshll.u32 %s447_s9, 4  ;;  %s478_s10 = int_to_ptr.vmem [resolvable:$true] %s21_s10 }
   0x2   :  { %s483_s13 = scalar_lea.hbm %s564_s0, 112  ;;  %s366_s16 = scalar_lea.hbm %s564_s0, 288 }
   0x3   :  { %p343_p0 = scmp.ne.s32.totalorder %s476_s8, %s366_s16  ;;  %s492_s19 = scalar_lea.hbm %s564_s0, 4096 }
   0x4   :  { %p345_p1 = scmp.lt.u32.totalorder %s476_s8, %s564_s0  ;;  %p346_p2 = scmp.lt.u32.totalorder %s492_s19, %s366_s16 }
   0x5   :  { %p348_p4 = scmp.lt.u32.totalorder %s366_s16, %s476_s8 }
   0x6   :  { %p347_p3 = por %p346_p2, %p345_p1 }
   0x8   :  { %p349_p5 = por %p348_p4, %p347_p3 }
   0xa   :  { %p350_p6 = pnand %p349_p5, %p343_p0 }
   0xc   :  { %353 = shalt.err (!%p350_p6)  }
   0xd   :  { %s354_s22 = scalar_lea.vmem %s478_s10, 256  ;;  %s503_s23 = scalar_lea.vmem %s478_s10, 1536 }
   0xe   :  { %p355_p7 = scmp.ne.s32.totalorder %s478_s10, %s354_s22  ;;  %p359_p8 = scmp.lt.s32.totalorder %s478_s10, %s478_s10 }
   0xf   :  { %p360_p9 = scmp.lt.s32.totalorder %s503_s23, %s354_s22 }
  0x11   :  { %p361_p10 = por %p360_p9, %p359_p8 }
  0x13   :  { %p362_p11 = pnand %p361_p10, %p355_p7 }
  0x15   :  { %365 = shalt.err (!%p362_p11)  }
  0x16   :  { %s448_s24 = smov 256   ;;  %s449_s25 = smov 16  }
  0x17   :  { %s450_s26 = smov 1   ;;  %s516_s29 = scalar_lea.hbm %s564_s0, 192 }
  0x18   :  { %24 = dma.hbm_to_vmem [thread:$0]  %s476_s8, 256, %s478_s10, [#allocation3], %s448_s24, %s449_s25, %s450_s26 }
  0x19   :  { %s451_s30 = smov [#allocation2 + $0x10]   ;;  %s452_s3 = smov [#allocation2 + $0x20]  }
  0x1a   :  { %s29_s2 = sshll.u32 %s451_s30, 4  ;;  %s37_s4 = sshll.u32 %s452_s3, 4  ;;  %s30_s2 = int_to_ptr.vmem [resolvable:$true] %s29_s2  ;;  %s38_s4 = int_to_ptr.vmem [resolvable:$true] %s37_s4 }
  0x1b   :  { %s391_s7 = scalar_lea.hbm %s564_s0, 368  ;;  %p370_p13 = scmp.lt.u32.totalorder %s483_s13, %s564_s0 }
  0x1c   :  { %p368_p12 = scmp.ne.s32.totalorder %s483_s13, %s391_s7  ;;  %p371_p0 = scmp.lt.u32.totalorder %s492_s19, %s391_s7 }
  0x1d   :  { %p373_p2 = scmp.lt.u32.totalorder %s391_s7, %s483_s13 }
  0x1e   :  { %p372_p1 = por %p371_p0, %p370_p13 }
  0x20   :  { %p374_p3 = por %p373_p2, %p372_p1 }
  0x22   :  { %p375_p4 = pnand %p374_p3, %p368_p12 }
  0x24   :  { %378 = shalt.err (!%p375_p4)  }
  0x25   :  { %s379_s8 = scalar_lea.vmem %s30_s2, 256  ;;  %p384_p6 = scmp.lt.s32.totalorder %s30_s2, %s478_s10 }
  0x26   :  { %p380_p5 = scmp.ne.s32.totalorder %s30_s2, %s379_s8  ;;  %p385_p7 = scmp.lt.s32.totalorder %s503_s23, %s379_s8 }
  0x28   :  { %p386_p8 = por %p385_p7, %p384_p6 }
  0x2a   :  { %p387_p9 = pnand %p386_p8, %p380_p5 }
  0x2c   :  { %390 = shalt.err (!%p387_p9)  }
  0x2d   :  { %32 = dma.hbm_to_vmem [thread:$0]  %s483_s13, 256, %s30_s2, [#allocation3 + $0x1], %s448_s24, %s449_s25, %s450_s26 }
  0x2e   :  { %s416_s15 = scalar_lea.hbm %s564_s0, 448  ;;  %p395_p11 = scmp.lt.u32.totalorder %s516_s29, %s564_s0 }
  0x2f   :  { %p393_p10 = scmp.ne.s32.totalorder %s516_s29, %s416_s15  ;;  %p396_p12 = scmp.lt.u32.totalorder %s492_s19, %s416_s15 }
  0x30   :  { %p398_p0 = scmp.lt.u32.totalorder %s416_s15, %s516_s29 }
  0x31   :  { %p397_p13 = por %p396_p12, %p395_p11 }
  0x33   :  { %p399_p1 = por %p398_p0, %p397_p13 }
  0x35   :  { %p400_p2 = pnand %p399_p1, %p393_p10 }
  0x37   :  { %403 = shalt.err (!%p400_p2)  }
  0x38   :  { %s404_s18 = scalar_lea.vmem %s38_s4, 256  ;;  %p409_p4 = scmp.lt.s32.totalorder %s38_s4, %s478_s10 }
  0x39   :  { %p405_p3 = scmp.ne.s32.totalorder %s38_s4, %s404_s18  ;;  %p410_p5 = scmp.lt.s32.totalorder %s503_s23, %s404_s18 }
  0x3b   :  { %p411_p6 = por %p410_p5, %p409_p4 }
  0x3d   :  { %p412_p7 = pnand %p411_p6, %p405_p3 }
  0x3f   :  { %415 = shalt.err (!%p412_p7)  }
  0x40   :  { %40 = dma.hbm_to_vmem [thread:$0]  %s516_s29, 256, %s38_s4, [#allocation3 + $0x2], %s448_s24, %s449_s25, %s450_s26 }
  0x41   :  { %439 = dma.done.wait [#allocation3], 256 }
  0x42   :  { %440 = vsyncadd [#allocation3], 4294967040 }
  0x43   :  { %441 = dma.done.wait [#allocation3 + $0x1], 256 }
  0x44   :  { %442 = vsyncadd [#allocation3 + $0x1], 4294967040 }
  0x45   :  { %443 = dma.done.wait [#allocation3 + $0x2], 256 }
  0x46   :  { %444 = vsyncadd [#allocation3 + $0x2], 4294967040  ;;  %v119_v0 = vld [vmem:[#allocation2] sm:$0xff]  ;;  %s453_s0 = smov 122   ;;  %s454_s13 = smov 126   ;;  %v120_v1 = vld [vmem:[#allocation2 + $0x8] sm:$0xff] }
  0x47   :  { %123 = vrot.lane.b32.xlu1 %v119_v0, %s453_s0  ;;  %110 = vrot.lane.b32.xlu0 %v119_v0, %s454_s13  ;;  %s455_s10 = smov 118   ;;  %v146_v2 = vld [vmem:[#allocation2 + $0x18] sm:$0xff]  ;;  %v145_v3 = vld [vmem:[#allocation2 + $0x10] sm:$0xff]  ;;  %s456_s19 = smov 125   ;;  %v185_v4 = vld [vmem:[#allocation2 + $0x28] sm:$0xff]  ;;  %vm116_vm0 = vcmask 7168  }
  0x48   :  { %s457_s20 = smov 121   ;;  %v184_v5 = vld [vmem:[#allocation2 + $0x20] sm:$0xff]  ;;  %s458_s21 = smov 4   ;;  %vm129_vm1 = vcmask 15368   ;;  %vm142_vm2 = vcmask 23568   ;;  %vm155_vm3 = vcmask 31768  }
  0x49   :  { %s459_s22 = smov 124   ;;  %vm168_vm4 = vcmask 39968   ;;  %vm181_vm5 = vcmask 48168   ;;  %vm194_vm6 = vcmask 56368   ;;  %vm199_vm7 = vcmask 64568   ;;  %s460_s23 = smov [#allocation4]  }
  0x4a   :  { %s220_s24 = sshll.u32 %s460_s23, 4  ;;  %vm212_vm8 = vcmask 72768   ;;  %s221_s24 = int_to_ptr.vmem [resolvable:$true] %s220_s24 }
  0x4b   :  { %125 = vrot.lane.b32.xlu1 %v120_v1, %s453_s0  ;;  %112 = vrot.lane.b32.xlu0 %v120_v1, %s454_s13  ;;  %s417_s25 = scalar_lea.vmem %s221_s24, 256  ;;  %p422_p9 = scmp.lt.s32.totalorder %s221_s24, %s221_s24 }
  0x4c   :  { %p418_p8 = scmp.ne.s32.totalorder %s221_s24, %s417_s25  ;;  %p423_p10 = scmp.lt.s32.totalorder %s417_s25, %s417_s25 }
  0x4e   :  { %p424_p11 = por %p423_p10, %p422_p9 }
  0x4f   :  { %138 = vrot.lane.b32.xlu1 %v120_v1, %s455_s10  ;;  %136 = vrot.lane.b32.xlu0 %v119_v0, %s455_s10 }
  0x50   :  { %p425_p12 = pnand %p424_p11, %p418_p8 }
  0x53   :  { %151 = vrot.lane.b32.xlu1 %v146_v2, %s450_s26  ;;  %149 = vrot.lane.b32.xlu0 %v145_v3, %s450_s26 }
  0x57   :  { %164 = vrot.lane.b32.xlu1 %v146_v2, %s456_s19  ;;  %162 = vrot.lane.b32.xlu0 %v145_v3, %s456_s19 }
  0x5b   :  { %177 = vrot.lane.b32.xlu1 %v146_v2, %s457_s20  ;;  %175 = vrot.lane.b32.xlu0 %v145_v3, %s457_s20 }
  0x5f   :  { %190 = vrot.lane.b32.xlu1 %v185_v4, %s458_s21  ;;  %188 = vrot.lane.b32.xlu0 %v184_v5, %s458_s21 }
  0x63   :  { %208 = vrot.lane.b32.xlu1 %v185_v4, %s459_s22  ;;  %206 = vrot.lane.b32.xlu0 %v184_v5, %s459_s22 }
  0xb9   :  { %v124_v6 = vpop.permute.xlu1 %123  ;;  %v111_v7 = vpop.permute.xlu0 %110 }
  0xba   :  { %117 = vst.msk [vmem:[#allocation4] sm:$0xff] %vm116_vm0, %v111_v7 }
  0xbb   :  { %130 = vst.msk [vmem:[#allocation4] sm:$0xff] %vm129_vm1, %v124_v6 }
  0xbd   :  { %v126_v8 = vpop.permute.xlu1 %125  ;;  %v113_v9 = vpop.permute.xlu0 %112 }
  0xbe   :  { %118 = vst.msk [vmem:[#allocation4 + $0x8] sm:$0xff] %vm116_vm0, %v113_v9 }
  0xbf   :  { %131 = vst.msk [vmem:[#allocation4 + $0x8] sm:$0xff] %vm129_vm1, %v126_v8 }
  0xc1   :  { %v139_v10 = vpop.permute.xlu1 %138  ;;  %v137_v11 = vpop.permute.xlu0 %136 }
  0xc2   :  { %144 = vst.msk [vmem:[#allocation4 + $0x8] sm:$0xff] %vm142_vm2, %v139_v10  ;;  %143 = vst.msk [vmem:[#allocation4] sm:$0xff] %vm142_vm2, %v137_v11 }
  0xc5   :  { %v152_v12 = vpop.permute.xlu1 %151  ;;  %v150_v13 = vpop.permute.xlu0 %149 }
  0xc6   :  { %157 = vst.msk [vmem:[#allocation4 + $0x8] sm:$0xff] %vm155_vm3, %v152_v12  ;;  %156 = vst.msk [vmem:[#allocation4] sm:$0xff] %vm155_vm3, %v150_v13 }
  0xc9   :  { %v165_v14 = vpop.permute.xlu1 %164  ;;  %v163_v15 = vpop.permute.xlu0 %162 }
  0xca   :  { %170 = vst.msk [vmem:[#allocation4 + $0x8] sm:$0xff] %vm168_vm4, %v165_v14  ;;  %169 = vst.msk [vmem:[#allocation4] sm:$0xff] %vm168_vm4, %v163_v15 }
  0xcd   :  { %v178_v16 = vpop.permute.xlu1 %177  ;;  %v176_v17 = vpop.permute.xlu0 %175 }
  0xce   :  { %183 = vst.msk [vmem:[#allocation4 + $0x8] sm:$0xff] %vm181_vm5, %v178_v16  ;;  %182 = vst.msk [vmem:[#allocation4] sm:$0xff] %vm181_vm5, %v176_v17 }
  0xd1   :  { %v191_v18 = vpop.permute.xlu1 %190  ;;  %v189_v19 = vpop.permute.xlu0 %188 }
  0xd2   :  { %196 = vst.msk [vmem:[#allocation4 + $0x8] sm:$0xff] %vm194_vm6, %v191_v18  ;;  %195 = vst.msk [vmem:[#allocation4] sm:$0xff] %vm194_vm6, %v189_v19 }
  0xd3   :  { %201 = vst.msk [vmem:[#allocation4 + $0x8] sm:$0xff] %vm199_vm7, %v185_v4  ;;  %200 = vst.msk [vmem:[#allocation4] sm:$0xff] %vm199_vm7, %v184_v5 }
  0xd5   :  { %v209_v20 = vpop.permute.xlu1 %208  ;;  %v207_v21 = vpop.permute.xlu0 %206 }
  0xd6   :  { %214 = vst.msk [vmem:[#allocation4 + $0x8] sm:$0xff] %vm212_vm8, %v209_v20  ;;  %213 = vst.msk [vmem:[#allocation4] sm:$0xff] %vm212_vm8, %v207_v21 }
  0xd7   :  { %428 = shalt.err (!%p425_p12)
}
  0xd8   :  { %s429_s28 = scalar_lea.hbm %s565_s1, 256 }
  0xd9   :  { %p430_p13 = scmp.ne.s32.totalorder %s565_s1, %s429_s28  ;;  %p433_p0 = scmp.lt.u32.totalorder %s429_s28, %s565_s1 }
  0xdb   :  { %p435_p1 = pnand %p433_p0, %p430_p13 }
  0xdd   :  { %438 = shalt.err (!%p435_p1)
}
  0xde   :  { %s461_s4 = smov 128   ;;  %s462_s5 = smov 8  }
  0xdf   :  { %226 = dma.vmem_to_hbm [thread:$0]  %s221_s24, 256, %s565_s1, [#allocation5], %s461_s4, %s461_s4, %s462_s5  }
  0xe0   :  { %445 = dma.done.wait [#allocation5], 256  }
  0xe1   :  { %446 = vsyncadd [#allocation5], 4294967040 }
  0xe2   :  { %230 = vsyncpa [#allocation5], 1 }
  0xe3   :  { %231 = vsyncmov [#allocation3] }
  0xe6   :  { %s232_s9 = vpop.sfrf %231 }
  0xe7   :  { %p320_p2 = scmp.ne.s32.totalorder %s232_s9, 0 }
  0xe9   :  { %236 = shalt.err (%p320_p2)  }
  0xea   :  { %238 = vsyncmov [#allocation3 + $0x1] }
  0xed   :  { %s239_s11 = vpop.sfrf %238 }
  0xee   :  { %p321_p3 = scmp.ne.s32.totalorder %s239_s11, 0 }
  0xf0   :  { %243 = shalt.err (%p321_p3)  }
  0xf1   :  { %245 = vsyncmov [#allocation3 + $0x2] }
  0xf4   :  { %s246_s8 = vpop.sfrf %245 }
  0xf5   :  { %p322_p4 = scmp.ne.s32.totalorder %s246_s8, 0 }
  0xf7   :  { %250 = shalt.err (%p322_p4)  }
  0xf8   :  { %252 = vsyncmov [#allocation3 + $0x3] }
  0xfb   :  { %s253_s12 = vpop.sfrf %252 }
  0xfc   :  { %p323_p5 = scmp.ne.s32.totalorder %s253_s12, 0 }
  0xfe   :  { %257 = shalt.err (%p323_p5)  }
  0xff   :  { %259 = vsyncmov [#allocation3 + $0x4] }
 0x102   :  { %s260_s1 = vpop.sfrf %259 }
 0x103   :  { %p324_p6 = scmp.ne.s32.totalorder %s260_s1, 0 }
 0x105   :  { %264 = shalt.err (%p324_p6)  }
 0x106   :  { %266 = vsyncmov [#allocation3 + $0x5] }
 0x109   :  { %s267_s14 = vpop.sfrf %266 }
 0x10a   :  { %p325_p7 = scmp.ne.s32.totalorder %s267_s14, 0 }
 0x10c   :  { %271 = shalt.err (%p325_p7)  }

</bundles_post_ra>
